<compile_context>
chip_gen: v5e
topology: v5e:2x2
jax: 0.10.0
libtpu: 0.0.40
codegen_flags: <defaults>
</compile_context>

<pallas_src>
import functools

import jax
import jax.numpy as jnp
from jax.experimental import pallas as pl
from jax.experimental.pallas import tpu as pltpu


# ---------------------------------------------------------------------------
# Device-aware budgets
# ---------------------------------------------------------------------------
def _vmem_capacity_bytes():
    try:
        return int(pltpu.get_tpu_info().vmem_capacity_bytes)
    except Exception:
        return 64 << 20  # conservative fallback (v7x physical VMEM)


def _is_v5_device():
    try:
        return "v5" in jax.devices()[0].device_kind.lower()
    except Exception:
        return False


# ---------------------------------------------------------------------------
# Tiling helpers
# ---------------------------------------------------------------------------
def _pick_tile_rows(bc, itemsize, cap=256):
    """Largest divisor of bc that is a multiple of the sublane pack and <= cap.
    Falls back to the full row extent (a full-dim block is always legal)."""
    pack = 8 * max(4 // itemsize, 1)  # 8 for f32, 16 for bf16, 32 for int8
    best = None
    r = pack
    while r <= min(bc, cap):
        if bc % r == 0:
            best = r
        r += pack
    return best if best is not None else bc


def _pick_tile_cols(hw, rows, itemsize, budget_bytes):
    """Lane tile: multiple of 128, sized so the apply pass's 6 resident blocks
    (2 inputs + 1 output, double-buffered) fit the budget; capped at 2048 lanes
    where the HBM roofline fraction has long saturated."""
    max_t = budget_bytes // max(6 * rows * itemsize, 1)
    t = min(int(max_t), 2048)
    t = max((t // 128) * 128, 128)
    t = min(t, pl.cdiv(hw, 128) * 128)
    return int(t)


# ---------------------------------------------------------------------------
# Pass 1: per-row channel sums, fully parallel over both grid axes.
# ---------------------------------------------------------------------------
def _pool_kernel(left_ref, right_ref, psum_ref, *, hw, tile_cols, has_tail):
    # left_ref / right_ref : [R, T]   tile of the flattened [B*C, H*W] inputs
    # psum_ref             : [1, R, 1] partial sum owned by this column block
    s = left_ref[...].astype(jnp.float32) + right_ref[...].astype(jnp.float32)
    if has_tail:
        # Padded tail lanes are undefined -> mask them out of the reduction.
        j = pl.program_id(1)
        col = jax.lax.broadcasted_iota(jnp.int32, s.shape, 1)
        s = jnp.where(col + j * tile_cols < hw, s, 0.0)
    psum_ref[0, :, :] = jnp.sum(s, axis=-1, keepdims=True)


# ---------------------------------------------------------------------------
# Pass 2: tiny attention kernel (runs once per forward, batched over B).
# ---------------------------------------------------------------------------
def _attn_kernel(s_ref, w1t_ref, w2t_ref, att0_ref, att1_ref, *, inv_hw, C):
    # s_ref   : [B, C]   pooled channel sums
    # w1t_ref : [C, d]   conv_du 1x1 weight, transposed
    # w2t_ref : [d, 2C]  fcs[0]/fcs[1] 1x1 weights, stacked & transposed
    s = s_ref[...].astype(jnp.float32) * inv_hw                      # [B, C]  mean
    z = jnp.dot(s, w1t_ref[...].astype(jnp.float32),
                preferred_element_type=jnp.float32)                  # [B, d]
    z = jnp.where(z >= 0.0, z, 0.2 * z)                              # LeakyReLU(0.2)
    a = jnp.dot(z, w2t_ref[...].astype(jnp.float32),
                preferred_element_type=jnp.float32)                  # [B, 2C]
    a0 = a[:, :C]
    a1 = a[:, C:]
    # 2-way softmax over the branch axis; exact divide is fine (runs once).
    m = jnp.maximum(a0, a1)
    e0 = jnp.exp(a0 - m)
    e1 = jnp.exp(a1 - m)
    inv = 1.0 / (e0 + e1)
    att0_ref[...] = e0 * inv
    att1_ref[...] = e1 * inv


# ---------------------------------------------------------------------------
# Pass 3: apply attention, tiled (R, T), both axes parallel.
# ---------------------------------------------------------------------------
def _apply_kernel(left_ref, right_ref, att_ref, out_ref, *, compute_dtype):
    l = left_ref[...].astype(compute_dtype)       # [R, T]
    r = right_ref[...].astype(compute_dtype)
    a = att_ref[...].astype(compute_dtype)        # [R, 2] packed (att0, att1)
    a0 = a[:, 0:1]                                # [R, 1] broadcast over lanes
    a1 = a[:, 1:2]
    out_ref[...] = (l * a0 + r * a1).astype(out_ref.dtype)


# ---------------------------------------------------------------------------
# Wrapper
# ---------------------------------------------------------------------------
def skff_pallas(left, right, w1, w2a, w2b):
    """left, right: [B, C, H, W] (NCHW). Returns [B, C, H, W]."""
    B, C, H, W = left.shape
    HW = H * W
    BC = B * C
    d = w1.shape[0]
    assert w1.shape == (d, C) and w2a.shape == (C, d) and w2b.shape == (C, d)

    itemsize = jnp.dtype(left.dtype).itemsize
    vmem_cap = _vmem_capacity_bytes()
    vmem_limit_cap = int(vmem_cap * 0.85)   # ~54 MiB on v7x, ~109 MiB on v5e/v6e
    tile_budget = int(vmem_cap * 0.55)      # budget for the apply pass's 6 blocks

    R = _pick_tile_rows(BC, itemsize)
    T = _pick_tile_cols(HW, R, itemsize, tile_budget)
    n_rows = pl.cdiv(BC, R)                 # R divides BC (or R == BC)
    n_cols = pl.cdiv(HW, T)
    has_tail = (n_cols * T != HW)
    block_bytes = R * T * itemsize

    left_f = left.reshape(BC, HW)
    right_f = right.reshape(BC, HW)

    pool_vmem = min(vmem_limit_cap, max(4 * block_bytes + (4 << 20), 32 << 20))
    apply_vmem = min(vmem_limit_cap, max(6 * block_bytes + (4 << 20), 32 << 20))

    # ---- pass 1: partial channel sums, one [1, R, 1] block per grid point ----
    pool_kernel = functools.partial(_pool_kernel, hw=HW, tile_cols=T,
                                    has_tail=has_tail)
    partials = pl.pallas_call(
        pool_kernel,
        out_shape=jax.ShapeDtypeStruct((n_cols, BC, 1), jnp.float32),
        grid_spec=pltpu.PrefetchScalarGridSpec(
            num_scalar_prefetch=0,
            grid=(n_rows, n_cols),
            # NOTE: add pipeline_mode=pl.Buffered(3) on the two big inputs if
            # profiling shows exposed DMA for very small C (tiny blocks).
            in_specs=[
                pl.BlockSpec((R, T), lambda i, j: (i, j)),
                pl.BlockSpec((R, T), lambda i, j: (i, j)),
            ],
            out_specs=pl.BlockSpec((1, R, 1), lambda i, j: (j, i, 0)),
        ),
        compiler_params=pltpu.CompilerParams(
            dimension_semantics=("parallel", "parallel"),
            vmem_limit_bytes=pool_vmem,
        ),
        cost_estimate=pl.CostEstimate(
            flops=2 * BC * HW,
            transcendentals=0,
            bytes_accessed=2 * BC * HW * itemsize + n_cols * BC * 4,
        ),
    )(left_f, right_f)

    ssum = jnp.sum(partials, axis=0).reshape(B, C)   # tiny finishing reduction

    # ---- pass 2: attention vectors (tiny, batched over B) -------------------
    w1t = w1.T.astype(jnp.float32)                                      # [C, d]
    w2t = jnp.concatenate([w2a, w2b], axis=0).T.astype(jnp.float32)     # [d, 2C]

    attn_kernel = functools.partial(_attn_kernel, inv_hw=1.0 / float(HW), C=C)
    att0, att1 = pl.pallas_call(
        attn_kernel,
        out_shape=(
            jax.ShapeDtypeStruct((B, C), jnp.float32),
            jax.ShapeDtypeStruct((B, C), jnp.float32),
        ),
        grid_spec=pltpu.PrefetchScalarGridSpec(
            num_scalar_prefetch=0,
            grid=(1,),
            in_specs=[
                pl.BlockSpec((B, C), lambda i: (0, 0)),
                pl.BlockSpec((C, d), lambda i: (0, 0)),
                pl.BlockSpec((d, 2 * C), lambda i: (0, 0)),
            ],
            out_specs=[
                pl.BlockSpec((B, C), lambda i: (0, 0)),
                pl.BlockSpec((B, C), lambda i: (0, 0)),
            ],
        ),
        compiler_params=pltpu.CompilerParams(
            dimension_semantics=("arbitrary",),
        ),
    )(ssum, w1t, w2t)

    # Pack att0/att1 into one [B*C, 2] stream (one fewer DMA stream in pass 3).
    att = jnp.stack([att0, att1], axis=-1).reshape(BC, 2)

    # ---- pass 3: apply attention --------------------------------------------
    # bf16 FMA only on chips with bf16 VALUs (v6e/v7x); force f32 on v5e.
    compute_dtype = (jnp.bfloat16
                     if (left.dtype == jnp.bfloat16 and not _is_v5_device())
                     else jnp.float32)

    apply_kernel = functools.partial(_apply_kernel, compute_dtype=compute_dtype)
    out = pl.pallas_call(
        apply_kernel,
        out_shape=jax.ShapeDtypeStruct((BC, HW), left.dtype),
        grid_spec=pltpu.PrefetchScalarGridSpec(
            num_scalar_prefetch=0,
            grid=(n_rows, n_cols),
            in_specs=[
                pl.BlockSpec((R, T), lambda i, j: (i, j)),
                pl.BlockSpec((R, T), lambda i, j: (i, j)),
                pl.BlockSpec((R, 2), lambda i, j: (i, 0)),
            ],
            out_specs=pl.BlockSpec((R, T), lambda i, j: (i, j)),
        ),
        compiler_params=pltpu.CompilerParams(
            dimension_semantics=("parallel", "parallel"),
            vmem_limit_bytes=apply_vmem,
        ),
        cost_estimate=pl.CostEstimate(
            flops=3 * BC * HW,
            transcendentals=0,
            bytes_accessed=3 * BC * HW * itemsize,
        ),
    )(left_f, right_f, att)

    return out.reshape(B, C, H, W)


def skff_reference(left, right, w1, w2a, w2b):
    """Pure-JAX reference mirroring the PyTorch forward, for verification."""
    u = left + right                                           # [B, C, H, W]
    s = jnp.mean(u, axis=(2, 3))                               # [B, C]
    z = jnp.einsum("dc,bc->bd", w1, s)                         # [B, d]
    z = jnp.where(z >= 0.0, z, 0.2 * z)
    a0 = jnp.einsum("cd,bd->bc", w2a, z)                       # [B, C]
    a1 = jnp.einsum("cd,bd->bc", w2b, z)                       # [B, C]
    logits = jnp.stack([a0, a1], axis=1)                       # [B, 2, C]
    att = jax.nn.softmax(logits, axis=1)                       # [B, 2, C]
    att0 = att[:, 0][:, :, None, None]
    att1 = att[:, 1][:, :, None, None]
    return left * att0 + right * att1


if __name__ == "__main__":
    def run_case(B, C, H, W, key):
        reduction = 8
        d = max(C // reduction, 4)
        k_l, k_r, k_w1, k_w2a, k_w2b = jax.random.split(key, 5)
        left = jax.random.normal(k_l, (B, C, H, W), dtype=jnp.float32)
        right = jax.random.normal(k_r, (B, C, H, W), dtype=jnp.float32)
        # Deterministic synthetic 1x1-conv weights (bias=False in the module).
        w1 = jax.random.normal(k_w1, (d, C), dtype=jnp.float32) * 0.1
        w2a = jax.random.normal(k_w2a, (C, d), dtype=jnp.float32) * 0.1
        w2b = jax.random.normal(k_w2b, (C, d), dtype=jnp.float32) * 0.1

        out = jax.block_until_ready(skff_pallas(left, right, w1, w2a, w2b))
        ref = skff_reference(left, right, w1, w2a, w2b)
        assert out.shape == (B, C, H, W)
        assert jnp.allclose(out, ref, atol=2e-5, rtol=2e-5), \
            f"Pallas output mismatch vs reference for shape {(B, C, H, W)}"

    key = jax.random.PRNGKey(0)
    k1, k2 = jax.random.split(key)
    run_case(2, 8, 16, 16, k1)   # regular case
    run_case(1, 8, 10, 10, k2)   # ragged spatial extent: exercises the masked tail

    print("KERNEL_OK")
</pallas_src>

<mosaic_0001>
module attributes {stable_mosaic.version = 11 : i64} {
  func.func @_pool_kernel(%arg0: i32, %arg1: i32, %arg2: memref<16x256xf32, #tpu.memory_space<vmem>>, %arg3: memref<16x256xf32, #tpu.memory_space<vmem>>, %arg4: memref<1x16x1xf32, #tpu.memory_space<vmem>>) attributes {dimension_semantics = [#tpu.dimension_semantics<parallel>, #tpu.dimension_semantics<parallel>], iteration_bounds = array<i64: 1, 1>, scalar_prefetch = 0 : i64, scratch_operands = 0 : i64, tpu.core_type = #tpu.core_type<tc>, window_params = [{transform_indices = @transform_0, window_bounds = array<i64: 16, 256>}, {transform_indices = @transform_1, window_bounds = array<i64: 16, 256>}, {transform_indices = @transform_2, window_bounds = array<i64: 1, 16, 1>}]} {
    %c0 = arith.constant 0 : index
    %c0_0 = arith.constant 0 : index
    %0 = vector.load %arg2[%c0, %c0_0] : memref<16x256xf32, #tpu.memory_space<vmem>>, vector<16x256xf32>
    %c0_1 = arith.constant 0 : index
    %c0_2 = arith.constant 0 : index
    %1 = vector.load %arg3[%c0_1, %c0_2] : memref<16x256xf32, #tpu.memory_space<vmem>>, vector<16x256xf32>
    %2 = arith.addf %0, %1 : vector<16x256xf32>
    %cst = arith.constant dense<0.000000e+00> : vector<16xf32>
    %3 = vector.multi_reduction <add>, %2, %cst [1] : vector<16x256xf32> to vector<16xf32>
    %4 = vector.shape_cast %3 : vector<16xf32> to vector<16x1xf32>
    %c0_3 = arith.constant 0 : index
    %c0_4 = arith.constant 0 : index
    %c0_5 = arith.constant 0 : index
    %5 = vector.load %arg4[%c0_3, %c0_4, %c0_5] : memref<1x16x1xf32, #tpu.memory_space<vmem>>, vector<1x16x1xf32>
    %6 = vector.shape_cast %5 : vector<1x16x1xf32> to vector<16x1xf32>
    %7 = vector.shape_cast %4 : vector<16x1xf32> to vector<1x16x1xf32>
    tpu.vector_store %arg4[%c0_3, %c0_4, %c0_5], %7 {strides = array<i32>} : memref<1x16x1xf32, #tpu.memory_space<vmem>>, vector<1x16x1xf32>,
    return
  }
  func.func @transform_0(%arg0: i32, %arg1: i32) -> (i32, i32) {
    %c0_i32 = arith.constant 0 : i32
    return %arg0, %arg1 : i32, i32
  }
  func.func @transform_1(%arg0: i32, %arg1: i32) -> (i32, i32) {
    %c0_i32 = arith.constant 0 : i32
    return %arg0, %arg1 : i32, i32
  }
  func.func @transform_2(%arg0: i32, %arg1: i32) -> (i32, i32, i32) {
    %c0_i32 = arith.constant 0 : i32
    %c0_i32_0 = arith.constant 0 : i32
    return %arg1, %arg0, %c0_i32 : i32, i32, i32
  }
}

</mosaic_0001>

<bundles_post_ra>
// kernel: tpu_custom_call.1
= control target key start
LH: loop header
LB: loop body
LE: loop exit
PB: predicated region body
PF: predicated region fallthrough
CT: control target
= control target key end

     0   :  { %7 = vsyncpa [#allocation3], 0  ;;  %s157_s0 = inlined_call_operand.hbm [shape: f32[16,256], index: 0, kind: input, shape index: {}]   ;;  %s158_s1 = inlined_call_operand.hbm [shape: f32[16,256], index: 1, kind: input, shape index: {}]   ;;  %s159_s2 = inlined_call_operand.vmem [shape: f32[1,16,1], index: 2, kind: output, shape index: {}]  }
   0x1   :  { %s13_s11 = sshll.u32 %s157_s0, 4  ;;  %s14_s11 = int_to_ptr.hbm [resolvable:$true] %s13_s11 }
   0x2   :  { %8 = vsyncpa [#allocation5], 0  ;;  %s126_s12 = smov [#allocation2]   ;;  %s26_s16 = sshll.u32 %s158_s1, 4  ;;  %s27_s16 = int_to_ptr.hbm [resolvable:$true] %s26_s16 }
   0x3   :  { %s15_s13 = sshll.u32 %s126_s12, 4  ;;  %s127_s17 = smov 256   ;;  %s16_s13 = int_to_ptr.vmem [resolvable:$true] %s15_s13 }
   0x4   :  { %s128_s18 = smov 16   ;;  %s129_s19 = smov [#allocation4]  }
   0x5   :  { %21 = dma.hbm_to_vmem [thread:$0]  %s14_s11, 512, %s16_s13, [#allocation3], %s127_s17, %s127_s17, %s128_s18  }
   0x6   :  { %s28_s20 = sshll.u32 %s129_s19, 4  ;;  %s29_s20 = int_to_ptr.vmem [resolvable:$true] %s28_s20 }
   0x7   :  { %34 = dma.hbm_to_vmem [thread:$0]  %s27_s16, 512, %s29_s20, [#allocation5], %s127_s17, %s127_s17, %s128_s18  }
   0x8   :  { %122 = dma.done.wait [#allocation3], 512  }
   0x9   :  { %123 = vsyncadd [#allocation3], 4294966784 }
   0xa   :  { %124 = dma.done.wait [#allocation5], 512  }
   0xb   :  { %125 = vsyncadd [#allocation5], 4294966784  ;;  %v43_v0 = vld [vmem:[#allocation2] sm:$0xff]  ;;  %v44_v1 = vld [vmem:[#allocation2 + $0x8] sm:$0xff]  ;;  %vm61_vm0 = vcmask 7168  }
   0xc   :  { %v47_v2 = vld [vmem:[#allocation4] sm:$0xff]  ;;  %v48_v3 = vld [vmem:[#allocation4 + $0x8] sm:$0xff]  ;;  %v45_v6 = vld [vmem:[#allocation2 + $0x10] sm:$0xff] }
   0xd   :  { %v51_v4 = vadd.f32 %v47_v2, %v43_v0  ;;  %v52_v5 = vadd.f32 %v48_v3, %v44_v1  ;;  %v46_v7 = vld [vmem:[#allocation2 + $0x18] sm:$0xff]  ;;  %v49_v8 = vld [vmem:[#allocation4 + $0x10] sm:$0xff] }
   0xe   :  { %v50_v9 = vld [vmem:[#allocation4 + $0x18] sm:$0xff]  ;;  %v53_v11 = vadd.f32 %v49_v8, %v45_v6 }
   0xf   :  { %v55_v10 = vadd.f32 %v52_v5, %v51_v4  ;;  %v54_v12 = vadd.f32 %v50_v9, %v46_v7 }
  0x11   :  { %56 = vadd.xlane.f32.xlu0 %v55_v10  ;;  %v58_v13 = vadd.f32 %v54_v12, %v53_v11 }
  0x19   :  { %59 = vadd.xlane.f32.xlu0 %v58_v13 }
  0x84   :  { %v57_v14 = vpop.xlane.xlu0 %56 }
  0x85   :  { %62 = vst.msk [vmem:[%s159_s2] sm:$0xff] %vm61_vm0, %v57_v14 }
  0x8c   :  { %v60_v15 = vpop.xlane.xlu0 %59 }
  0x8d   :  { %63 = vst.msk [vmem:[%s159_s2 + $0x8] sm:$0xff] %vm61_vm0, %v60_v15 }
  0x8e   :  { %68 = vsyncpa [#allocation3], 1 }
  0x8f   :  { %69 = vsyncpa [#allocation5], 1 }

</bundles_post_ra>
